<compile_context>
chip_gen: v5e
topology: v5e:2x2
jax: 0.10.0
libtpu: 0.0.40
codegen_flags: <defaults>
</compile_context>

<pallas_src>
import functools

import jax
import jax.numpy as jnp
from jax import lax
from jax.experimental import pallas as pl
from jax.experimental.pallas import tpu as pltpu

IGNORE_INDEX = 100000


def _choose_block_rows(rows, nx, ny, x_itemsize, y_itemsize):
    """Pick a row-tile that is a multiple of 8 sublanes and keeps the
    double-buffered input streams well under the default scoped VMEM
    (16 MiB on v5e, 32 MiB on v6e/v7x; v7x physical VMEM is only 64 MiB)."""
    budget = 8 * 1024 * 1024                      # bytes for all input double-buffers
    per_row = 2 * (nx * x_itemsize + ny * y_itemsize)   # x/y logits, x2 pipeline buffers
    per_row += 2 * 2 * 128 * 4                    # lane-padded target + weight blocks
    tr = budget // max(per_row, 1)
    tr = int(max(8, min(1024, tr)))
    tr -= tr % 8
    rows_up = ((rows + 7) // 8) * 8               # no point exceeding all rows
    return min(tr, rows_up)


def _nmt_nll_kernel(x_ref, y_ref, tgt_ref, w_ref, out_ref, *, total_rows, block_rows):
    """Flat weighted-NLL reduction over a (block_rows, N) tile of rows."""
    i = pl.program_id(0)

    @pl.when(i == 0)
    def _():
        out_ref[...] = jnp.zeros_like(out_ref)

    x = x_ref[...].astype(jnp.float32)            # (TR, Nx)  in-kernel upcast (bf16 ok)
    y = y_ref[...].astype(jnp.float32)            # (TR, Ny)
    labels = tgt_ref[...]                         # (TR, 2) int32 bin indices
    w = w_ref[...].astype(jnp.float32)            # (TR, 1)

    def axis_nll(scores, lbl):
        # scores: (TR, N) f32 logits, lbl: (TR, 1) int32.
        # nll = lse - z[lbl]; the full logp = z - lse array is never materialized.
        m = jnp.max(scores, axis=-1, keepdims=True)
        z = scores - m
        lse = jnp.log(jnp.sum(jnp.exp(z), axis=-1, keepdims=True))     # (TR, 1)
        bins = lax.broadcasted_iota(jnp.int32, scores.shape, 1)
        picked = jnp.sum(jnp.where(bins == lbl, z, 0.0), axis=-1, keepdims=True)
        # NLLLoss(reduction='none', ignore_index=IGNORE_INDEX).
        # Note: labels that are out-of-range but != IGNORE_INDEX would raise in PyTorch;
        # here they contribute lse (no bin matched) — only diverges on invalid inputs.
        return jnp.where(lbl != IGNORE_INDEX, lse - picked, 0.0)       # (TR, 1)

    nll_x = axis_nll(x, labels[:, 0:1])
    nll_y = axis_nll(y, labels[:, 1:2])

    # Mask rows of the (possibly padded) trailing block.
    row = i * block_rows + lax.broadcasted_iota(jnp.int32, (block_rows, 1), 0)
    row_valid = row < total_rows
    contrib = jnp.where(row_valid, (nll_x + nll_y) * w, 0.0)           # (TR, 1)
    out_ref[...] = out_ref[...] + jnp.sum(contrib)


def nmt_norm_criterion(output_x, output_y, target, target_weight, label_smoothing=0.0):
    """output_x/output_y: (B, J, N) logits (f32 or bf16), target: (B, J, 2) int bin
    indices, target_weight: (B, J, 1) float.  Returns scalar f32 loss."""
    if label_smoothing != 0.0:
        # TODO(synk): label_smoothing > 0 (KLDivLoss soft-label branch) not implemented.
        raise NotImplementedError("label_smoothing > 0 is not supported by this kernel")

    batch, num_joints, nx = output_x.shape
    if batch == 0:
        return jnp.float32(0.0)
    ny = output_y.shape[-1]
    rows = batch * num_joints

    # Free, contiguous reshapes — no transposes, no extra HBM traffic.
    x2 = output_x.reshape(rows, nx)
    y2 = output_y.reshape(rows, ny)
    t2 = target.reshape(rows, 2).astype(jnp.int32)
    w2 = target_weight.reshape(rows, 1).astype(jnp.float32)

    tr = _choose_block_rows(rows, nx, ny, x2.dtype.itemsize, y2.dtype.itemsize)
    grid = (pl.cdiv(rows, tr),)

    kernel = functools.partial(_nmt_nll_kernel, total_rows=rows, block_rows=tr)
    cost = pl.CostEstimate(
        flops=6 * rows * (nx + ny),
        transcendentals=rows * (nx + ny) + 2 * rows,
        bytes_accessed=rows * (nx * x2.dtype.itemsize + ny * y2.dtype.itemsize + 12) + 4,
    )

    # Resident (1,1) scalar accumulator -> row axis is "arbitrary" (serial on one TC).
    # On v7x this leaves one TensorCore idle, which is acceptable for a loss-sized
    # reduction; a per-block partial-sum output would be needed to go dual-core.
    out = pl.pallas_call(
        kernel,
        out_shape=jax.ShapeDtypeStruct((1, 1), jnp.float32),
        grid_spec=pltpu.PrefetchScalarGridSpec(
            num_scalar_prefetch=0,
            grid=grid,
            in_specs=[
                pl.BlockSpec((tr, nx), lambda i: (i, 0)),
                pl.BlockSpec((tr, ny), lambda i: (i, 0)),
                pl.BlockSpec((tr, 2), lambda i: (i, 0)),
                pl.BlockSpec((tr, 1), lambda i: (i, 0)),
            ],
            out_specs=pl.BlockSpec((1, 1), lambda i: (0, 0)),
        ),
        compiler_params=pltpu.CompilerParams(
            dimension_semantics=("arbitrary",)),
        cost_estimate=cost,
    )(x2, y2, t2, w2)
    return out[0, 0] / (batch * num_joints)


def _reference(output_x, output_y, target, target_weight):
    """Pure-JAX reference mirroring the PyTorch forward (label_smoothing=0)."""
    B, J, _ = output_x.shape

    def nll(scores, labels):
        logp = jax.nn.log_softmax(scores.astype(jnp.float32), axis=-1)
        safe = jnp.clip(labels, 0, scores.shape[-1] - 1)
        picked = jnp.take_along_axis(logp, safe[:, None], axis=-1)[:, 0]
        return jnp.where(labels != IGNORE_INDEX, -picked, 0.0)

    total = jnp.float32(0.0)
    for j in range(J):
        w = target_weight[:, j, 0].astype(jnp.float32)
        total += jnp.mean(nll(output_x[:, j], target[:, j, 0]) * w)
        total += jnp.mean(nll(output_y[:, j], target[:, j, 1]) * w)
    return total / J


if __name__ == "__main__":
    key = jax.random.PRNGKey(0)

    def run_case(B, J, NX, NY, dtype, tol):
        global key
        key, k1, k2, k3, k4, k5 = jax.random.split(key, 6)
        ox = jax.random.normal(k1, (B, J, NX), dtype=jnp.float32).astype(dtype)
        oy = jax.random.normal(k2, (B, J, NY), dtype=jnp.float32).astype(dtype)
        tx = jax.random.randint(k3, (B, J), 0, NX)
        ty = jax.random.randint(k4, (B, J), 0, NY)
        tgt = jnp.stack([tx, ty], axis=-1).astype(jnp.int32)
        tgt = tgt.at[0, 0, 0].set(IGNORE_INDEX)          # exercise ignore_index path
        tw = jax.random.uniform(k5, (B, J, 1), dtype=jnp.float32)

        loss = nmt_norm_criterion(ox, oy, tgt, tw)
        loss = jax.block_until_ready(loss)
        ref = _reference(ox, oy, tgt, tw)
        assert jnp.allclose(loss, ref, rtol=tol, atol=tol), (
            (B, J, NX, NY, str(dtype)), float(loss), float(ref))

    # f32, rows divisible by 8
    run_case(B=4, J=4, NX=128, NY=128, dtype=jnp.float32, tol=1e-5)
    # f32, ragged rows (15) + different bin counts per axis -> trailing-block masking
    run_case(B=3, J=5, NX=128, NY=256, dtype=jnp.float32, tol=1e-5)
    # bf16 logits kept in HBM as bf16, upcast in-kernel
    run_case(B=4, J=4, NX=128, NY=128, dtype=jnp.bfloat16, tol=1e-4)

    print("KERNEL_OK")
</pallas_src>

<mosaic_0001>
module attributes {stable_mosaic.version = 11 : i64} {
  func.func @_nmt_nll_kernel(%arg0: i32, %arg1: memref<16x128xf32, #tpu.memory_space<vmem>>, %arg2: memref<16x128xf32, #tpu.memory_space<vmem>>, %arg3: memref<16x2xi32, #tpu.memory_space<vmem>>, %arg4: memref<16x1xf32, #tpu.memory_space<vmem>>, %arg5: memref<1x1xf32, #tpu.memory_space<vmem>>) attributes {dimension_semantics = [#tpu.dimension_semantics<arbitrary>], iteration_bounds = array<i64: 1>, scalar_prefetch = 0 : i64, scratch_operands = 0 : i64, tpu.core_type = #tpu.core_type<tc>, window_params = [{transform_indices = @transform_0, window_bounds = array<i64: 16, 128>}, {transform_indices = @transform_1, window_bounds = array<i64: 16, 128>}, {transform_indices = @transform_2, window_bounds = array<i64: 16, 2>}, {transform_indices = @transform_3, window_bounds = array<i64: 16, 1>}, {pipeline_mode = #tpu.pipeline_mode<synchronous>, transform_indices = @transform_4, window_bounds = array<i64: 1, 1>}]} {
    %c0_i32 = arith.constant 0 : i32
    %0 = arith.cmpi eq, %arg0, %c0_i32 : i32
    %1 = arith.extui %0 : i1 to i32
    %c0_i32_0 = arith.constant 0 : i32
    %2 = arith.cmpi ne, %1, %c0_i32_0 : i32
    scf.if %2 {
      %cst_25 = arith.constant 0.000000e+00 : f32
      %67 = vector.broadcast %cst_25 : f32 to vector<1x1xf32>
      %c0_26 = arith.constant 0 : index
      %c0_27 = arith.constant 0 : index
      %68 = vector.load %arg5[%c0_26, %c0_27] : memref<1x1xf32, #tpu.memory_space<vmem>>, vector<1x1xf32>
      tpu.vector_store %arg5[%c0_26, %c0_27], %67 {strides = array<i32>} : memref<1x1xf32, #tpu.memory_space<vmem>>, vector<1x1xf32>,
    } else {
    }
    %c0 = arith.constant 0 : index
    %c0_1 = arith.constant 0 : index
    %3 = vector.load %arg1[%c0, %c0_1] : memref<16x128xf32, #tpu.memory_space<vmem>>, vector<16x128xf32>
    %c0_2 = arith.constant 0 : index
    %c0_3 = arith.constant 0 : index
    %4 = vector.load %arg2[%c0_2, %c0_3] : memref<16x128xf32, #tpu.memory_space<vmem>>, vector<16x128xf32>
    %c0_4 = arith.constant 0 : index
    %c0_5 = arith.constant 0 : index
    %5 = vector.load %arg3[%c0_4, %c0_5] : memref<16x2xi32, #tpu.memory_space<vmem>>, vector<16x2xi32>
    %c0_6 = arith.constant 0 : index
    %c0_7 = arith.constant 0 : index
    %6 = vector.load %arg4[%c0_6, %c0_7] : memref<16x1xf32, #tpu.memory_space<vmem>>, vector<16x1xf32>
    %7 = vector.extract_strided_slice %5 {offsets = [0, 0], sizes = [16, 1], strides = [1, 1]} : vector<16x2xi32> to vector<16x1xi32>
    %cst = arith.constant dense<0xFF800000> : vector<16xf32>
    %8 = vector.multi_reduction <maximumf>, %3, %cst [1] : vector<16x128xf32> to vector<16xf32>
    %9 = vector.shape_cast %8 : vector<16xf32> to vector<16x1xf32>
    %10 = vector.broadcast %9 : vector<16x1xf32> to vector<16x128xf32>
    %11 = arith.subf %3, %10 : vector<16x128xf32>
    %12 = math.exp %11 : vector<16x128xf32>
    %cst_8 = arith.constant dense<0.000000e+00> : vector<16xf32>
    %13 = vector.multi_reduction <add>, %12, %cst_8 [1] : vector<16x128xf32> to vector<16xf32>
    %14 = vector.shape_cast %13 : vector<16xf32> to vector<16x1xf32>
    %15 = math.log %14 : vector<16x1xf32>
    %16 = tpu.iota {dimensions = array<i32: 1>} : vector<16x128xi32>
    %17 = vector.broadcast %7 : vector<16x1xi32> to vector<16x128xi32>
    %18 = arith.cmpi eq, %16, %17 : vector<16x128xi32>
    %cst_9 = arith.constant 0.000000e+00 : f32
    %19 = vector.broadcast %cst_9 : f32 to vector<16x128xf32>
    %20 = arith.select %18, %11, %19 : vector<16x128xi1>, vector<16x128xf32>
    %cst_10 = arith.constant dense<0.000000e+00> : vector<16xf32>
    %21 = vector.multi_reduction <add>, %20, %cst_10 [1] : vector<16x128xf32> to vector<16xf32>
    %22 = vector.shape_cast %21 : vector<16xf32> to vector<16x1xf32>
    %c100000_i32 = arith.constant 100000 : i32
    %23 = vector.broadcast %c100000_i32 : i32 to vector<16x1xi32>
    %24 = arith.cmpi ne, %7, %23 : vector<16x1xi32>
    %25 = arith.subf %15, %22 : vector<16x1xf32>
    %cst_11 = arith.constant 0.000000e+00 : f32
    %26 = vector.broadcast %cst_11 : f32 to vector<16x1xf32>
    %27 = arith.select %24, %25, %26 : vector<16x1xi1>, vector<16x1xf32>
    %28 = vector.extract_strided_slice %5 {offsets = [0, 1], sizes = [16, 1], strides = [1, 1]} : vector<16x2xi32> to vector<16x1xi32>
    %cst_12 = arith.constant dense<0xFF800000> : vector<16xf32>
    %29 = vector.multi_reduction <maximumf>, %4, %cst_12 [1] : vector<16x128xf32> to vector<16xf32>
    %30 = vector.shape_cast %29 : vector<16xf32> to vector<16x1xf32>
    %31 = vector.broadcast %30 : vector<16x1xf32> to vector<16x128xf32>
    %32 = arith.subf %4, %31 : vector<16x128xf32>
    %33 = math.exp %32 : vector<16x128xf32>
    %cst_13 = arith.constant dense<0.000000e+00> : vector<16xf32>
    %34 = vector.multi_reduction <add>, %33, %cst_13 [1] : vector<16x128xf32> to vector<16xf32>
    %35 = vector.shape_cast %34 : vector<16xf32> to vector<16x1xf32>
    %36 = math.log %35 : vector<16x1xf32>
    %37 = tpu.iota {dimensions = array<i32: 1>} : vector<16x128xi32>
    %38 = vector.broadcast %28 : vector<16x1xi32> to vector<16x128xi32>
    %39 = arith.cmpi eq, %37, %38 : vector<16x128xi32>
    %cst_14 = arith.constant 0.000000e+00 : f32
    %40 = vector.broadcast %cst_14 : f32 to vector<16x128xf32>
    %41 = arith.select %39, %32, %40 : vector<16x128xi1>, vector<16x128xf32>
    %cst_15 = arith.constant dense<0.000000e+00> : vector<16xf32>
    %42 = vector.multi_reduction <add>, %41, %cst_15 [1] : vector<16x128xf32> to vector<16xf32>
    %43 = vector.shape_cast %42 : vector<16xf32> to vector<16x1xf32>
    %c100000_i32_16 = arith.constant 100000 : i32
    %44 = vector.broadcast %c100000_i32_16 : i32 to vector<16x1xi32>
    %45 = arith.cmpi ne, %28, %44 : vector<16x1xi32>
    %46 = arith.subf %36, %43 : vector<16x1xf32>
    %cst_17 = arith.constant 0.000000e+00 : f32
    %47 = vector.broadcast %cst_17 : f32 to vector<16x1xf32>
    %48 = arith.select %45, %46, %47 : vector<16x1xi1>, vector<16x1xf32>
    %c16_i32 = arith.constant 16 : i32
    %49 = arith.muli %arg0, %c16_i32 : i32
    %50 = tpu.iota {dimensions = array<i32: 0>} : vector<16x1xi32>
    %51 = vector.broadcast %49 : i32 to vector<16x1xi32>
    %52 = arith.addi %51, %50 : vector<16x1xi32>
    %c16_i32_18 = arith.constant 16 : i32
    %53 = vector.broadcast %c16_i32_18 : i32 to vector<16x1xi32>
    %54 = arith.cmpi slt, %52, %53 : vector<16x1xi32>
    %55 = arith.addf %27, %48 : vector<16x1xf32>
    %56 = arith.mulf %55, %6 : vector<16x1xf32>
    %cst_19 = arith.constant 0.000000e+00 : f32
    %57 = vector.broadcast %cst_19 : f32 to vector<16x1xf32>
    %58 = arith.select %54, %56, %57 : vector<16x1xi1>, vector<16x1xf32>
    %c0_20 = arith.constant 0 : index
    %c0_21 = arith.constant 0 : index
    %59 = vector.load %arg5[%c0_20, %c0_21] : memref<1x1xf32, #tpu.memory_space<vmem>>, vector<1x1xf32>
    %60 = vector.shape_cast %58 : vector<16x1xf32> to vector<1x16x1xf32>
    %cst_22 = arith.constant dense<0.000000e+00> : vector<1xf32>
    %61 = vector.multi_reduction <add>, %60, %cst_22 [1, 2] : vector<1x16x1xf32> to vector<1xf32>
    %62 = vector.shape_cast %61 : vector<1xf32> to vector<1x1x1xf32>
    %63 = vector.extract %62[0, 0, 0] : f32 from vector<1x1x1xf32>
    %64 = vector.broadcast %63 : f32 to vector<1x1xf32>
    %65 = arith.addf %59, %64 : vector<1x1xf32>
    %c0_23 = arith.constant 0 : index
    %c0_24 = arith.constant 0 : index
    %66 = vector.load %arg5[%c0_23, %c0_24] : memref<1x1xf32, #tpu.memory_space<vmem>>, vector<1x1xf32>
    tpu.vector_store %arg5[%c0_23, %c0_24], %65 {strides = array<i32>} : memref<1x1xf32, #tpu.memory_space<vmem>>, vector<1x1xf32>,
    return
  }
  func.func @transform_0(%arg0: i32) -> (i32, i32) {
    %c0_i32 = arith.constant 0 : i32
    %c0_i32_0 = arith.constant 0 : i32
    return %arg0, %c0_i32 : i32, i32
  }
  func.func @transform_1(%arg0: i32) -> (i32, i32) {
    %c0_i32 = arith.constant 0 : i32
    %c0_i32_0 = arith.constant 0 : i32
    return %arg0, %c0_i32 : i32, i32
  }
  func.func @transform_2(%arg0: i32) -> (i32, i32) {
    %c0_i32 = arith.constant 0 : i32
    %c0_i32_0 = arith.constant 0 : i32
    return %arg0, %c0_i32 : i32, i32
  }
  func.func @transform_3(%arg0: i32) -> (i32, i32) {
    %c0_i32 = arith.constant 0 : i32
    %c0_i32_0 = arith.constant 0 : i32
    return %arg0, %c0_i32 : i32, i32
  }
  func.func @transform_4(%arg0: i32) -> (i32, i32) {
    %c0_i32 = arith.constant 0 : i32
    %c0_i32_0 = arith.constant 0 : i32
    %c0_i32_1 = arith.constant 0 : i32
    return %c0_i32, %c0_i32_0 : i32, i32
  }
}

</mosaic_0001>

<bundles_post_ra>
// kernel: tpu_custom_call.1
= control target key start
LH: loop header
LB: loop body
LE: loop exit
PB: predicated region body
PF: predicated region fallthrough
CT: control target
= control target key end

     0   :  { %v218_v2 = vmov 1   ;;  %s295_s0 = inlined_call_operand.vmem [shape: f32[16,128], index: 0, kind: input, shape index: {}]   ;;  %s296_s1 = inlined_call_operand.vmem [shape: f32[16,128], index: 1, kind: input, shape index: {}]   ;;  %s297_s2 = inlined_call_operand.vmem [shape: s32[16,2], index: 2, kind: input, shape index: {}]   ;;  %s298_s3 = inlined_call_operand.vmem [shape: f32[16,1], index: 3, kind: input, shape index: {}]   ;;  %s299_s4 = inlined_call_operand.hbm [shape: f32[1,1], index: 4, kind: output, shape index: {}]  }
   0x1   :  { %v26_v0 = vld [vmem:[%s296_s1] sm:$0xff]  ;;  %172 = vset.pattern.permute.xlu1 %v218_v2 }
   0x2   :  { %v254_v1 = vld [vmem:[%s297_s2] sm:$0xff]  ;;  %72 = vmax.xlane.f32.xlu0 %v26_v0 }
   0x3   :  { %v24_v3 = vld [vmem:[%s295_s0] sm:$0xff]  ;;  %91 = vperm.xlu1 %172, %v254_v1  }
   0x4   :  { %32 = vmax.xlane.f32.xlu2 %v24_v3 }
   0x5   :  { %9 = vsyncpa [#allocation3], 0  ;;  %v219_v4 = vmov 0   ;;  %v27_v5 = vld [vmem:[%s296_s1 + $0x8] sm:$0xff]  ;;  %v50_v8 = vlaneseq  ;;  %vm66_vm3 = vcmp.ne.s32.totalorder %v254_v1, 100000  ;;  %v30_v59 = vld [vmem:[%s298_s3] sm:$0xff] }
   0x6   :  { %173 = vset.pattern.permute.xlu2 %v219_v4  ;;  %174 = vset.pattern.permute.xlu0 %v219_v4  ;;  %v266_v6 = vld [vmem:[%s297_s2 + $0x8] sm:$0xff]  ;;  %vm132_vm6 = vcmask 7168   ;;  %vm22_vm7 = vcmask 0   ;;  %s156_s6 = sshll.u32 %s299_s4, 4  ;;  %s157_s6 = int_to_ptr.hbm [resolvable:$true] %s156_s6 }
   0x7   :  { %v25_v7 = vld [vmem:[%s295_s0 + $0x8] sm:$0xff]  ;;  %v51_v9 = vand.u32 127, %v50_v8  ;;  %s220_s0 = smov 127   ;;  %vm67_vm5 = vcmp.ne.s32.totalorder %v266_v6, 100000 }
   0x8   :  { %v31_v60 = vld [vmem:[%s298_s3 + $0x8] sm:$0xff]  ;;  %s222_s3 = smov [#allocation2]  }
   0x9   :  { %s154_s29 = sshll.u32 %s222_s3, 4  ;;  %s155_s29 = int_to_ptr.vmem [resolvable:$true] %s154_s29 }
   0xa   :  { %74 = vmax.xlane.f32.xlu0 %v27_v5 }
   0xb   :  { %94 = vperm.xlu1 %172, %v266_v6  }
   0xc   :  { %34 = vmax.xlane.f32.xlu2 %v25_v7 }
  0x24   :  { %53 = vperm.xlu2 %173, %v254_v1  }
  0x75   :  { %v73_v10 = vpop.xlane.xlu0 %72  ;;  %v92_v11 = vpop.permute.xlu1 %91 }
  0x76   :  { %v76_v12 = vsub.f32 %v26_v0, %v73_v10  ;;  %vm96_vm0 = vcmp.eq.s32.totalorder %v51_v9, %v92_v11 }
  0x77   :  { %v33_v22 = vpop.xlane.xlu2 %32 }
  0x78   :  { %v78_v13 = vmul.f32 1.442695, %v76_v12  ;;  %v98_v14 = vsel %vm96_vm0, %v76_v12, 0.0  ;;  %v36_v26 = vsub.f32 %v24_v3, %v33_v22 }
  0x79   :  { %100 = vadd.xlane.f32.xlu2 %v98_v14 }
  0x7a   :  { %176 = vpow2.f32 %v78_v13  ;;  %v38_v30 = vmul.f32 1.442695, %v36_v26 }
  0x7d   :  { %v75_v15 = vpop.xlane.xlu0 %74  ;;  %v95_v16 = vpop.permute.xlu1 %94 }
  0x7e   :  { %v77_v17 = vsub.f32 %v27_v5, %v75_v15  ;;  %vm97_vm1 = vcmp.eq.s32.totalorder %v51_v9, %v95_v16  ;;  %v221_v5 = vmov 0.0  }
  0x7f   :  { %v35_v23 = vpop.xlane.xlu2 %34  ;;  %23 = vst.msk [vmem:[#allocation2] sm:$0x1] %vm22_vm7, %v221_v5 }
  0x80   :  { %v177_v18 = vpop.eup %176  ;;  %v80_v19 = vmul.f32 1.442695, %v77_v17  ;;  %v99_v20 = vsel %vm97_vm1, %v77_v17, 0.0  ;;  %v37_v24 = vsub.f32 %v25_v7, %v35_v23 }
  0x81   :  { %82 = vadd.xlane.f32.xlu0 %v177_v18  ;;  %102 = vadd.xlane.f32.xlu1 %v99_v20 }
  0x82   :  { %178 = vpow2.f32 %v80_v19  ;;  %v40_v25 = vmul.f32 1.442695, %v37_v24 }
  0x84   :  { %180 = vpow2.f32 %v40_v25 }
  0x85   :  { %182 = vpow2.f32 %v38_v30 }
  0x86   :  { %v131_v13 = vld [vmem:[#allocation2] sm:$0x1] }
  0x87   :  { %v54_v27 = vpop.permute.xlu2 %53 }
  0x88   :  { %v179_v21 = vpop.eup %178  ;;  %vm58_vm2 = vcmp.eq.s32.totalorder %v51_v9, %v54_v27 }
  0x89   :  { %84 = vadd.xlane.f32.xlu1 %v179_v21  ;;  %v60_v28 = vsel %vm58_vm2, %v36_v26, 0.0 }
  0x8a   :  { %v181_v29 = vpop.eup %180 }
  0x8b   :  { %v183_v31 = vpop.eup %182 }
  0x91   :  { %62 = vadd.xlane.f32.xlu1 %v60_v28 }
  0x95   :  { %56 = vperm.xlu0 %174, %v266_v6  }
  0x99   :  { %44 = vadd.xlane.f32.xlu1 %v181_v29 }
  0x9d   :  { %175 = vset.pattern.permute.xlu0 %v218_v2 }
  0xbf   :  { %42 = vadd.xlane.f32.xlu0 %v183_v31 }
  0xec   :  { %v101_v35 = vpop.xlane.xlu2 %100 }
  0xf4   :  { %v83_v32 = vpop.xlane.xlu0 %82  ;;  %v103_v38 = vpop.xlane.xlu1 %102 }
  0xf5   :  { %184 = vlog2.f32 %v83_v32 }
  0xfb   :  { %v185_v33 = vpop.eup %184 }
  0xfc   :  { %v87_v34 = vmul.f32 0.6931472, %v185_v33  ;;  %v85_v41 = vpop.xlane.xlu1 %84 }
  0xfd   :  { %186 = vlog2.f32 %v85_v41 }
  0xfe   :  { %v104_v36 = vsub.f32 %v87_v34, %v101_v35 }
 0x100   :  { %v106_v37 = vsel %vm66_vm3, %v104_v36, 0.0 }
 0x101   :  { %119 = vrot.lane.b32.xlu1 %v106_v37, %s220_s0 }
 0x103   :  { %v187_v42 = vpop.eup %186 }
 0x104   :  { %v89_v43 = vmul.f32 0.6931472, %v187_v42  ;;  %v63_v46 = vpop.xlane.xlu1 %62 }
 0x106   :  { %v105_v44 = vsub.f32 %v89_v43, %v103_v38 }
 0x107   :  { %v57_v39 = vpop.permute.xlu0 %56 }
 0x108   :  { %vm59_vm4 = vcmp.eq.s32.totalorder %v51_v9, %v57_v39  ;;  %v107_v45 = vsel %vm67_vm5, %v105_v44, 0.0 }
 0x109   :  { %v61_v40 = vsel %vm59_vm4, %v37_v24, 0.0 }
 0x10a   :  { %64 = vadd.xlane.f32.xlu2 %v61_v40 }
 0x10c   :  { %v45_v48 = vpop.xlane.xlu1 %44 }
 0x122   :  { %121 = vrot.lane.b32.xlu2 %v107_v45, %s220_s0 }
 0x132   :  { %v43_v47 = vpop.xlane.xlu0 %42 }
 0x133   :  { %188 = vlog2.f32 %v43_v47 }
 0x134   :  { %190 = vlog2.f32 %v45_v48 }
 0x139   :  { %v189_v49 = vpop.eup %188 }
 0x13a   :  { %v47_v50 = vmul.f32 0.6931472, %v189_v49  ;;  %v191_v51 = vpop.eup %190 }
 0x13b   :  { %v49_v54 = vmul.f32 0.6931472, %v191_v51 }
 0x13c   :  { %v68_v52 = vsub.f32 %v47_v50, %v63_v46 }
 0x13e   :  { %v70_v56 = vsel %vm66_vm3, %v68_v52, 0.0 }
 0x173   :  { %v120_v55 = vpop.permute.xlu1 %119 }
 0x174   :  { %v125_v58 = vadd.f32 %v120_v55, %v70_v56 }
 0x176   :  { %v127_v63 = vmul.f32 %v125_v58, %v30_v59 }
 0x178   :  { %v133_v1 = vsel %vm132_vm6, %v127_v63, 0.0 }
 0x17d   :  { %v65_v53 = vpop.xlane.xlu2 %64 }
 0x17e   :  { %v69_v57 = vsub.f32 %v49_v54, %v65_v53 }
 0x180   :  { %v71_v61 = vsel %vm67_vm5, %v69_v57, 0.0 }
 0x185   :  { %v122_v62 = vpop.permute.xlu2 %121 }
 0x186   :  { %v126_v0 = vadd.f32 %v122_v62, %v71_v61 }
 0x188   :  { %v128_v2 = vmul.f32 %v126_v0, %v31_v60 }
 0x18a   :  { %v134_v3 = vsel %vm132_vm6, %v128_v2, 0.0 }
 0x18b   :  { %v135_v4 = vadd.f32 %v134_v3, %v133_v1 }
 0x18d   :  { %136 = vadd.xlane.f32.xlu0 %v135_v4 }
 0x200   :  { %v137_v7 = vpop.xlane.xlu0 %136 }
 0x201   :  { %v138_v8 = vrot.slane %v137_v7, 4 }
 0x203   :  { %v139_v9 = vadd.f32 %v138_v8, %v137_v7 }
 0x205   :  { %v140_v10 = vrot.slane %v139_v9, 2 }
 0x207   :  { %v141_v11 = vadd.f32 %v140_v10, %v139_v9 }
 0x209   :  { %v142_v6 = vrot.slane %v141_v11, 1 }
 0x20b   :  { %v143_v12 = vadd.f32 %v142_v6, %v141_v11 }
 0x20d   :  { %165 = vpush %v143_v12 }
 0x23e   :  { %s166_s7 = spop %165 }
 0x23f   :  { %v145_v14 = vstv %s166_s7 }
 0x240   :  { %v146_v15 = vadd.f32 %v145_v14, %v131_v13 }
 0x242   :  { %148 = vst.msk [vmem:[#allocation2] sm:$0x1] %vm22_vm7, %v146_v15 }
 0x243   :  { %159 = dma.vmem_to_hbm [thread:$0]  %s155_s29, 16, %s157_s6, [#allocation3]  }
 0x244   :  { %216 = dma.done.wait [#allocation3], 16  }
 0x245   :  { %217 = vsyncadd [#allocation3], 4294967280 }
 0x246   :  { %164 = vsyncpa [#allocation3], 1 }

</bundles_post_ra>
